<compile_context>
chip_gen: v5e
topology: v5e:2x2
jax: 0.10.0
libtpu: 0.0.40
codegen_flags: <defaults>
</compile_context>

<pallas_src>
import jax
import jax.numpy as jnp
from jax import lax
from jax.experimental import pallas as pl
from jax.experimental.pallas import tpu as pltpu


def _mhsa_kernel(num_heads, head_dim, scale):
    def kernel(xq_ref, xkv_ref,
               wq_ref, bq_ref, wk_ref, bk_ref, wv_ref, bv_ref,
               wo_ref, bo_ref,
               o_ref, acc_ref):
        h = pl.program_id(2)

        @pl.when(h == 0)
        def _():
            acc_ref[...] = jnp.zeros_like(acc_ref)

        # Activations -> bf16 for the MXU (accumulation stays f32).
        xq = xq_ref[0].astype(jnp.bfloat16)    # (TQ, E)
        xkv = xkv_ref[0].astype(jnp.bfloat16)  # (S,  E)

        wq = wq_ref[0]                          # (E, hd)  bf16
        wk = wk_ref[0]                          # (E, hd)  bf16
        wv = wv_ref[0]                          # (E, hd)  bf16
        wo = wo_ref[0]                          # (hd, E)  bf16

        # Per-head projections (f32 accumulation, f32 bias).
        q = jnp.dot(xq, wq, preferred_element_type=jnp.float32) + bq_ref[0]   # (TQ, hd)
        k = jnp.dot(xkv, wk, preferred_element_type=jnp.float32) + bk_ref[0]  # (S,  hd)
        v = jnp.dot(xkv, wv, preferred_element_type=jnp.float32) + bv_ref[0]  # (S,  hd)

        q = (q * scale).astype(jnp.bfloat16)
        k = k.astype(jnp.bfloat16)

        # Scores: contract head_dim of q with head_dim of k -- no explicit k.T.
        s = lax.dot_general(q, k,
                            dimension_numbers=(((1,), (1,)), ((), ())),
                            preferred_element_type=jnp.float32)               # (TQ, S)

        # Numerically-stable softmax; divide replaced by EUP approx reciprocal.
        s = s - jnp.max(s, axis=-1, keepdims=True)
        p = jnp.exp(s)
        denom = jnp.sum(p, axis=-1, keepdims=True)
        p = p * pl.reciprocal(denom, approx=True)

        o_h = jnp.dot(p.astype(jnp.bfloat16), v.astype(jnp.bfloat16),
                      preferred_element_type=jnp.float32)                     # (TQ, hd)

        # Per-head slice of the output projection, accumulated across heads.
        acc_ref[...] += jnp.dot(o_h.astype(jnp.bfloat16), wo,
                                preferred_element_type=jnp.float32)           # (TQ, E)

        @pl.when(h == num_heads - 1)
        def _():
            o_ref[0] = (acc_ref[...] + bo_ref[...]).astype(o_ref.dtype)

    return kernel


def multi_head_self_attention(x, params, num_heads):
    """x: (B, S, E) float32.  params: (E, E) weights stored (in, out), biases (1, E)."""
    B, S, E = x.shape
    head_dim = E // num_heads
    assert head_dim * num_heads == E, "embed_dim must be divisible by num_heads"

    # Host-side re-layout: split weights per head and cast to bf16 for the MXU.
    def split_in(w):   # (E_in, E_out) -> (H, E_in, hd): head h = output cols [h*hd, (h+1)*hd)
        return w.reshape(E, num_heads, head_dim).transpose(1, 0, 2).astype(jnp.bfloat16)

    def split_out(w):  # (E_in, E_out) -> (H, hd, E_out): head h = input rows [h*hd, (h+1)*hd)
        return w.reshape(num_heads, head_dim, E).astype(jnp.bfloat16)

    def split_bias(b):  # (1, E) -> (H, 1, hd), kept f32 (added after f32 accumulation)
        return b.reshape(num_heads, 1, head_dim)

    wq = split_in(params["wq"]); bq = split_bias(params["bq"])
    wk = split_in(params["wk"]); bk = split_bias(params["bk"])
    wv = split_in(params["wv"]); bv = split_bias(params["bv"])
    wo = split_out(params["wo"]); bo = params["bo"]          # (1, E) f32

    # Query-tile size: full S when small; 256-aligned tiles otherwise.
    if S <= 256:
        TQ = S
    else:
        TQ = 256
        assert S % TQ == 0, "S must be a multiple of 256 for the tiled path"
    grid = (B, S // TQ, num_heads)

    xq_spec = pl.BlockSpec((1, TQ, E), lambda b, qt, h: (b, qt, 0))
    xkv_spec = pl.BlockSpec((1, S, E), lambda b, qt, h: (b, 0, 0))
    w_in_spec = pl.BlockSpec((1, E, head_dim), lambda b, qt, h: (h, 0, 0))
    b_in_spec = pl.BlockSpec((1, 1, head_dim), lambda b, qt, h: (h, 0, 0))
    w_out_spec = pl.BlockSpec((1, head_dim, E), lambda b, qt, h: (h, 0, 0))
    b_out_spec = pl.BlockSpec((1, E), lambda b, qt, h: (0, 0))
    o_spec = pl.BlockSpec((1, TQ, E), lambda b, qt, h: (b, qt, 0))

    return pl.pallas_call(
        _mhsa_kernel(num_heads, head_dim, 1.0 / (head_dim ** 0.5)),
        out_shape=jax.ShapeDtypeStruct((B, S, E), x.dtype),
        grid_spec=pltpu.PrefetchScalarGridSpec(
            num_scalar_prefetch=0,
            grid=grid,
            in_specs=[xq_spec, xkv_spec,
                      w_in_spec, b_in_spec,   # query
                      w_in_spec, b_in_spec,   # key
                      w_in_spec, b_in_spec,   # value
                      w_out_spec, b_out_spec  # fc_out
                      ],
            out_specs=o_spec,
            scratch_shapes=[pltpu.VMEM((TQ, E), jnp.float32)]),
        compiler_params=pltpu.CompilerParams(
            dimension_semantics=("parallel", "parallel", "arbitrary"),
            vmem_limit_bytes=64 * 1024 * 1024),
    )(x, x, wq, bq, wk, bk, wv, bv, wo, bo)


def _reference(x, params, num_heads):
    """Plain-JAX f32 reference mirroring the PyTorch forward exactly."""
    B, S, E = x.shape
    hd = E // num_heads

    def lin(x, w, b):
        return x @ w + b  # w stored (in, out)

    Q = lin(x, params["wq"], params["bq"]).reshape(B, S, num_heads, hd)
    K = lin(x, params["wk"], params["bk"]).reshape(B, S, num_heads, hd)
    V = lin(x, params["wv"], params["bv"]).reshape(B, S, num_heads, hd)
    Q = Q.transpose(0, 2, 1, 3)
    K = K.transpose(0, 2, 1, 3)
    V = V.transpose(0, 2, 1, 3)
    scores = jnp.einsum("bhqd,bhkd->bhqk", Q, K) / (hd ** 0.5)
    w = jax.nn.softmax(scores, axis=-1)
    out = jnp.einsum("bhqk,bhkd->bhqd", w, V)
    out = out.transpose(0, 2, 1, 3).reshape(B, S, E)
    return lin(out, params["wo"], params["bo"])


if __name__ == "__main__":
    B, S, E = 2, 8, 32
    num_heads = 4

    key = jax.random.PRNGKey(0)
    keys = jax.random.split(key, 9)

    # Deterministic synthetic parameters (nn.Linear(E, E) shapes, stored (in, out)/(1, E)).
    def init_w(k):
        return jax.random.normal(k, (E, E), dtype=jnp.float32) * (E ** -0.5)

    def init_b(k):
        return jax.random.normal(k, (1, E), dtype=jnp.float32) * 0.01

    params = {
        "wq": init_w(keys[0]), "bq": init_b(keys[1]),
        "wk": init_w(keys[2]), "bk": init_b(keys[3]),
        "wv": init_w(keys[4]), "bv": init_b(keys[5]),
        "wo": init_w(keys[6]), "bo": init_b(keys[7]),
    }

    x = jax.random.normal(keys[8], (B, S, E), dtype=jnp.float32)

    out = multi_head_self_attention(x, params, num_heads)
    out = jax.block_until_ready(out)

    ref = _reference(x, params, num_heads)
    assert out.shape == (B, S, E)
    # bf16 MXU inputs + approx reciprocal -> small deviation from the f32 reference.
    max_err = float(jnp.max(jnp.abs(out - ref)))
    assert jnp.allclose(out, ref, atol=5e-2, rtol=5e-2), f"mismatch vs reference (max abs err {max_err})"

    print("KERNEL_OK")
</pallas_src>

<mosaic_0001>
module attributes {stable_mosaic.version = 11 : i64} {
  func.func @kernel(%arg0: i32, %arg1: i32, %arg2: i32, %arg3: memref<1x8x32xf32, #tpu.memory_space<vmem>>, %arg4: memref<1x8x32xf32, #tpu.memory_space<vmem>>, %arg5: memref<1x32x8xbf16, #tpu.memory_space<vmem>>, %arg6: memref<1x1x8xf32, #tpu.memory_space<vmem>>, %arg7: memref<1x32x8xbf16, #tpu.memory_space<vmem>>, %arg8: memref<1x1x8xf32, #tpu.memory_space<vmem>>, %arg9: memref<1x32x8xbf16, #tpu.memory_space<vmem>>, %arg10: memref<1x1x8xf32, #tpu.memory_space<vmem>>, %arg11: memref<1x8x32xbf16, #tpu.memory_space<vmem>>, %arg12: memref<1x32xf32, #tpu.memory_space<vmem>>, %arg13: memref<1x8x32xf32, #tpu.memory_space<vmem>>, %arg14: memref<8x32xf32, #tpu.memory_space<vmem>>) attributes {dimension_semantics = [#tpu.dimension_semantics<parallel>, #tpu.dimension_semantics<parallel>, #tpu.dimension_semantics<arbitrary>], iteration_bounds = array<i64: 2, 1, 4>, scalar_prefetch = 0 : i64, scratch_operands = 1 : i64, tpu.core_type = #tpu.core_type<tc>, window_params = [{transform_indices = @transform_0, window_bounds = array<i64: 1, 8, 32>}, {transform_indices = @transform_1, window_bounds = array<i64: 1, 8, 32>}, {transform_indices = @transform_2, window_bounds = array<i64: 1, 32, 8>}, {transform_indices = @transform_3, window_bounds = array<i64: 1, 1, 8>}, {transform_indices = @transform_4, window_bounds = array<i64: 1, 32, 8>}, {transform_indices = @transform_5, window_bounds = array<i64: 1, 1, 8>}, {transform_indices = @transform_6, window_bounds = array<i64: 1, 32, 8>}, {transform_indices = @transform_7, window_bounds = array<i64: 1, 1, 8>}, {transform_indices = @transform_8, window_bounds = array<i64: 1, 8, 32>}, {pipeline_mode = #tpu.pipeline_mode<synchronous>, transform_indices = @transform_9, window_bounds = array<i64: 1, 32>}, {transform_indices = @transform_10, window_bounds = array<i64: 1, 8, 32>}]} {
    %c0_i32 = arith.constant 0 : i32
    %0 = arith.cmpi eq, %arg2, %c0_i32 : i32
    %1 = arith.extui %0 : i1 to i32
    %c0_i32_0 = arith.constant 0 : i32
    %2 = arith.cmpi ne, %1, %c0_i32_0 : i32
    scf.if %2 {
      %cst_40 = arith.constant 0.000000e+00 : f32
      %58 = vector.broadcast %cst_40 : f32 to vector<8x32xf32>
      %c0_41 = arith.constant 0 : index
      %c0_42 = arith.constant 0 : index
      %59 = vector.load %arg14[%c0_41, %c0_42] : memref<8x32xf32, #tpu.memory_space<vmem>>, vector<8x32xf32>
      tpu.vector_store %arg14[%c0_41, %c0_42], %58 {strides = array<i32>} : memref<8x32xf32, #tpu.memory_space<vmem>>, vector<8x32xf32>,
    } else {
    }
    %c0 = arith.constant 0 : index
    %c0_1 = arith.constant 0 : index
    %c0_2 = arith.constant 0 : index
    %3 = vector.load %arg3[%c0, %c0_1, %c0_2] : memref<1x8x32xf32, #tpu.memory_space<vmem>>, vector<1x8x32xf32>
    %4 = vector.shape_cast %3 : vector<1x8x32xf32> to vector<8x32xf32>
    %5 = arith.truncf %4 : vector<8x32xf32> to vector<8x32xbf16>
    %c0_3 = arith.constant 0 : index
    %c0_4 = arith.constant 0 : index
    %c0_5 = arith.constant 0 : index
    %6 = vector.load %arg4[%c0_3, %c0_4, %c0_5] : memref<1x8x32xf32, #tpu.memory_space<vmem>>, vector<1x8x32xf32>
    %7 = vector.shape_cast %6 : vector<1x8x32xf32> to vector<8x32xf32>
    %8 = arith.truncf %7 : vector<8x32xf32> to vector<8x32xbf16>
    %c0_6 = arith.constant 0 : index
    %c0_7 = arith.constant 0 : index
    %c0_8 = arith.constant 0 : index
    %9 = vector.load %arg5[%c0_6, %c0_7, %c0_8] : memref<1x32x8xbf16, #tpu.memory_space<vmem>>, vector<1x32x8xbf16>
    %10 = vector.shape_cast %9 : vector<1x32x8xbf16> to vector<32x8xbf16>
    %c0_9 = arith.constant 0 : index
    %c0_10 = arith.constant 0 : index
    %c0_11 = arith.constant 0 : index
    %11 = vector.load %arg7[%c0_9, %c0_10, %c0_11] : memref<1x32x8xbf16, #tpu.memory_space<vmem>>, vector<1x32x8xbf16>
    %12 = vector.shape_cast %11 : vector<1x32x8xbf16> to vector<32x8xbf16>
    %c0_12 = arith.constant 0 : index
    %c0_13 = arith.constant 0 : index
    %c0_14 = arith.constant 0 : index
    %13 = vector.load %arg9[%c0_12, %c0_13, %c0_14] : memref<1x32x8xbf16, #tpu.memory_space<vmem>>, vector<1x32x8xbf16>
    %14 = vector.shape_cast %13 : vector<1x32x8xbf16> to vector<32x8xbf16>
    %c0_15 = arith.constant 0 : index
    %c0_16 = arith.constant 0 : index
    %c0_17 = arith.constant 0 : index
    %15 = vector.load %arg11[%c0_15, %c0_16, %c0_17] : memref<1x8x32xbf16, #tpu.memory_space<vmem>>, vector<1x8x32xbf16>
    %16 = vector.shape_cast %15 : vector<1x8x32xbf16> to vector<8x32xbf16>
    %cst = arith.constant dense<0.000000e+00> : vector<8x8xf32>
    %17 = tpu.matmul %5, %10, %cst {dimension_numbers = #tpu.dot_dimension_numbers<[1], [0], [0], [1], [0, 0, 1, 1], [], []>} : vector<8x32xbf16>, vector<32x8xbf16>, vector<8x8xf32> -> vector<8x8xf32>
    %c0_18 = arith.constant 0 : index
    %c0_19 = arith.constant 0 : index
    %c0_20 = arith.constant 0 : index
    %18 = vector.load %arg6[%c0_18, %c0_19, %c0_20] : memref<1x1x8xf32, #tpu.memory_space<vmem>>, vector<1x1x8xf32>
    %19 = vector.shape_cast %18 : vector<1x1x8xf32> to vector<1x8xf32>
    %20 = vector.broadcast %19 : vector<1x8xf32> to vector<8x8xf32>
    %21 = arith.addf %17, %20 : vector<8x8xf32>
    %cst_21 = arith.constant dense<0.000000e+00> : vector<8x8xf32>
    %22 = tpu.matmul %8, %12, %cst_21 {dimension_numbers = #tpu.dot_dimension_numbers<[1], [0], [0], [1], [0, 0, 1, 1], [], []>} : vector<8x32xbf16>, vector<32x8xbf16>, vector<8x8xf32> -> vector<8x8xf32>
    %c0_22 = arith.constant 0 : index
    %c0_23 = arith.constant 0 : index
    %c0_24 = arith.constant 0 : index
    %23 = vector.load %arg8[%c0_22, %c0_23, %c0_24] : memref<1x1x8xf32, #tpu.memory_space<vmem>>, vector<1x1x8xf32>
    %24 = vector.shape_cast %23 : vector<1x1x8xf32> to vector<1x8xf32>
    %25 = vector.broadcast %24 : vector<1x8xf32> to vector<8x8xf32>
    %26 = arith.addf %22, %25 : vector<8x8xf32>
    %cst_25 = arith.constant dense<0.000000e+00> : vector<8x8xf32>
    %27 = tpu.matmul %8, %14, %cst_25 {dimension_numbers = #tpu.dot_dimension_numbers<[1], [0], [0], [1], [0, 0, 1, 1], [], []>} : vector<8x32xbf16>, vector<32x8xbf16>, vector<8x8xf32> -> vector<8x8xf32>
    %c0_26 = arith.constant 0 : index
    %c0_27 = arith.constant 0 : index
    %c0_28 = arith.constant 0 : index
    %28 = vector.load %arg10[%c0_26, %c0_27, %c0_28] : memref<1x1x8xf32, #tpu.memory_space<vmem>>, vector<1x1x8xf32>
    %29 = vector.shape_cast %28 : vector<1x1x8xf32> to vector<1x8xf32>
    %30 = vector.broadcast %29 : vector<1x8xf32> to vector<8x8xf32>
    %31 = arith.addf %27, %30 : vector<8x8xf32>
    %cst_29 = arith.constant 0.353553385 : f32
    %32 = vector.broadcast %cst_29 : f32 to vector<8x8xf32>
    %33 = arith.mulf %21, %32 : vector<8x8xf32>
    %34 = arith.truncf %33 : vector<8x8xf32> to vector<8x8xbf16>
    %35 = arith.truncf %26 : vector<8x8xf32> to vector<8x8xbf16>
    %cst_30 = arith.constant dense<0.000000e+00> : vector<8x8xf32>
    %36 = tpu.matmul %34, %35, %cst_30 {dimension_numbers = #tpu.dot_dimension_numbers<[1], [1], [0], [0], [0, 0, 1, 0], [], []>} : vector<8x8xbf16>, vector<8x8xbf16>, vector<8x8xf32> -> vector<8x8xf32>
    %cst_31 = arith.constant dense<0xFF800000> : vector<8xf32>
    %37 = vector.multi_reduction <maximumf>, %36, %cst_31 [1] : vector<8x8xf32> to vector<8xf32>
    %38 = vector.shape_cast %37 : vector<8xf32> to vector<8x1xf32>
    %39 = vector.broadcast %38 : vector<8x1xf32> to vector<8x8xf32>
    %40 = arith.subf %36, %39 : vector<8x8xf32>
    %41 = math.exp %40 : vector<8x8xf32>
    %cst_32 = arith.constant dense<0.000000e+00> : vector<8xf32>
    %42 = vector.multi_reduction <add>, %41, %cst_32 [1] : vector<8x8xf32> to vector<8xf32>
    %43 = vector.shape_cast %42 : vector<8xf32> to vector<8x1xf32>
    %44 = tpu.reciprocal %43 {approx = true} : vector<8x1xf32> -> vector<8x1xf32>
    %45 = vector.broadcast %44 : vector<8x1xf32> to vector<8x8xf32>
    %46 = arith.mulf %41, %45 : vector<8x8xf32>
    %47 = arith.truncf %46 : vector<8x8xf32> to vector<8x8xbf16>
    %48 = arith.truncf %31 : vector<8x8xf32> to vector<8x8xbf16>
    %cst_33 = arith.constant dense<0.000000e+00> : vector<8x8xf32>
    %49 = tpu.matmul %47, %48, %cst_33 {dimension_numbers = #tpu.dot_dimension_numbers<[1], [0], [0], [1], [0, 0, 1, 1], [], []>} : vector<8x8xbf16>, vector<8x8xbf16>, vector<8x8xf32> -> vector<8x8xf32>
    %c0_34 = arith.constant 0 : index
    %c0_35 = arith.constant 0 : index
    %50 = vector.load %arg14[%c0_34, %c0_35] : memref<8x32xf32, #tpu.memory_space<vmem>>, vector<8x32xf32>
    %51 = arith.truncf %49 : vector<8x8xf32> to vector<8x8xbf16>
    %cst_36 = arith.constant dense<0.000000e+00> : vector<8x32xf32>
    %52 = tpu.matmul %51, %16, %cst_36 {dimension_numbers = #tpu.dot_dimension_numbers<[1], [0], [0], [1], [0, 0, 1, 1], [], []>} : vector<8x8xbf16>, vector<8x32xbf16>, vector<8x32xf32> -> vector<8x32xf32>
    %53 = arith.addf %50, %52 : vector<8x32xf32>
    %c0_37 = arith.constant 0 : index
    %c0_38 = arith.constant 0 : index
    %54 = vector.load %arg14[%c0_37, %c0_38] : memref<8x32xf32, #tpu.memory_space<vmem>>, vector<8x32xf32>
    tpu.vector_store %arg14[%c0_37, %c0_38], %53 {strides = array<i32>} : memref<8x32xf32, #tpu.memory_space<vmem>>, vector<8x32xf32>,
    %c3_i32 = arith.constant 3 : i32
    %55 = arith.cmpi eq, %arg2, %c3_i32 : i32
    %56 = arith.extui %55 : i1 to i32
    %c0_i32_39 = arith.constant 0 : i32
    %57 = arith.cmpi ne, %56, %c0_i32_39 : i32
    scf.if %57 {
      %c0_40 = arith.constant 0 : index
      %c0_41 = arith.constant 0 : index
      %58 = vector.load %arg14[%c0_40, %c0_41] : memref<8x32xf32, #tpu.memory_space<vmem>>, vector<8x32xf32>
      %c0_42 = arith.constant 0 : index
      %c0_43 = arith.constant 0 : index
      %59 = vector.load %arg12[%c0_42, %c0_43] : memref<1x32xf32, #tpu.memory_space<vmem>>, vector<1x32xf32>
      %60 = vector.broadcast %59 : vector<1x32xf32> to vector<8x32xf32>
      %61 = arith.addf %58, %60 : vector<8x32xf32>
      %c0_44 = arith.constant 0 : index
      %c0_45 = arith.constant 0 : index
      %c0_46 = arith.constant 0 : index
      %62 = vector.load %arg13[%c0_44, %c0_45, %c0_46] : memref<1x8x32xf32, #tpu.memory_space<vmem>>, vector<1x8x32xf32>
      %63 = vector.shape_cast %62 : vector<1x8x32xf32> to vector<8x32xf32>
      %64 = vector.shape_cast %61 : vector<8x32xf32> to vector<1x8x32xf32>
      tpu.vector_store %arg13[%c0_44, %c0_45, %c0_46], %64 {strides = array<i32>} : memref<1x8x32xf32, #tpu.memory_space<vmem>>, vector<1x8x32xf32>,
    } else {
    }
    return
  }
  func.func @transform_0(%arg0: i32, %arg1: i32, %arg2: i32) -> (i32, i32, i32) {
    %c0_i32 = arith.constant 0 : i32
    %c0_i32_0 = arith.constant 0 : i32
    return %arg0, %arg1, %c0_i32 : i32, i32, i32
  }
  func.func @transform_1(%arg0: i32, %arg1: i32, %arg2: i32) -> (i32, i32, i32) {
    %c0_i32 = arith.constant 0 : i32
    %c0_i32_0 = arith.constant 0 : i32
    %c0_i32_1 = arith.constant 0 : i32
    return %arg0, %c0_i32, %c0_i32_0 : i32, i32, i32
  }
  func.func @transform_2(%arg0: i32, %arg1: i32, %arg2: i32) -> (i32, i32, i32) {
    %c0_i32 = arith.constant 0 : i32
    %c0_i32_0 = arith.constant 0 : i32
    %c0_i32_1 = arith.constant 0 : i32
    return %arg2, %c0_i32, %c0_i32_0 : i32, i32, i32
  }
  func.func @transform_3(%arg0: i32, %arg1: i32, %arg2: i32) -> (i32, i32, i32) {
    %c0_i32 = arith.constant 0 : i32
    %c0_i32_0 = arith.constant 0 : i32
    %c0_i32_1 = arith.constant 0 : i32
    return %arg2, %c0_i32, %c0_i32_0 : i32, i32, i32
  }
  func.func @transform_4(%arg0: i32, %arg1: i32, %arg2: i32) -> (i32, i32, i32) {
    %c0_i32 = arith.constant 0 : i32
    %c0_i32_0 = arith.constant 0 : i32
    %c0_i32_1 = arith.constant 0 : i32
    return %arg2, %c0_i32, %c0_i32_0 : i32, i32, i32
  }
  func.func @transform_5(%arg0: i32, %arg1: i32, %arg2: i32) -> (i32, i32, i32) {
    %c0_i32 = arith.constant 0 : i32
    %c0_i32_0 = arith.constant 0 : i32
    %c0_i32_1 = arith.constant 0 : i32
    return %arg2, %c0_i32, %c0_i32_0 : i32, i32, i32
  }
  func.func @transform_6(%arg0: i32, %arg1: i32, %arg2: i32) -> (i32, i32, i32) {
    %c0_i32 = arith.constant 0 : i32
    %c0_i32_0 = arith.constant 0 : i32
    %c0_i32_1 = arith.constant 0 : i32
    return %arg2, %c0_i32, %c0_i32_0 : i32, i32, i32
  }
  func.func @transform_7(%arg0: i32, %arg1: i32, %arg2: i32) -> (i32, i32, i32) {
    %c0_i32 = arith.constant 0 : i32
    %c0_i32_0 = arith.constant 0 : i32
    %c0_i32_1 = arith.constant 0 : i32
    return %arg2, %c0_i32, %c0_i32_0 : i32, i32, i32
  }
  func.func @transform_8(%arg0: i32, %arg1: i32, %arg2: i32) -> (i32, i32, i32) {
    %c0_i32 = arith.constant 0 : i32
    %c0_i32_0 = arith.constant 0 : i32
    %c0_i32_1 = arith.constant 0 : i32
    return %arg2, %c0_i32, %c0_i32_0 : i32, i32, i32
  }
  func.func @transform_9(%arg0: i32, %arg1: i32, %arg2: i32) -> (i32, i32) {
    %c0_i32 = arith.constant 0 : i32
    %c0_i32_0 = arith.constant 0 : i32
    %c0_i32_1 = arith.constant 0 : i32
    return %c0_i32, %c0_i32_0 : i32, i32
  }
  func.func @transform_10(%arg0: i32, %arg1: i32, %arg2: i32) -> (i32, i32, i32) {
    %c0_i32 = arith.constant 0 : i32
    %c0_i32_0 = arith.constant 0 : i32
    return %arg0, %arg1, %c0_i32 : i32, i32, i32
  }
}

</mosaic_0001>

<bundles_post_ra>
// kernel: tpu_custom_call.1
= control target key start
LH: loop header
LB: loop body
LE: loop exit
PB: predicated region body
PF: predicated region fallthrough
CT: control target
= control target key end

     0   :  { %s1393_s0 = inlined_call_operand.vmem [shape: f32[2,8,32], index: 0, kind: input, shape index: {}]   ;;  %s1394_s1 = inlined_call_operand.vmem [shape: f32[2,8,32], index: 1, kind: input, shape index: {}]   ;;  %s1395_s2 = inlined_call_operand.vmem [shape: bf16[4,32,8], index: 2, kind: input, shape index: {}]   ;;  %s1396_s3 = inlined_call_operand.vmem [shape: f32[4,1,8], index: 3, kind: input, shape index: {}]   ;;  %s1397_s4 = inlined_call_operand.vmem [shape: bf16[4,32,8], index: 4, kind: input, shape index: {}]   ;;  %s1398_s5 = inlined_call_operand.vmem [shape: f32[4,1,8], index: 5, kind: input, shape index: {}]   ;;  %s1399_s6 = inlined_call_operand.vmem [shape: bf16[4,32,8], index: 6, kind: input, shape index: {}]   ;;  %s1400_s7 = inlined_call_operand.vmem [shape: f32[4,1,8], index: 7, kind: input, shape index: {}]   ;;  %s1401_s8 = inlined_call_operand.vmem [shape: bf16[4,8,32], index: 8, kind: input, shape index: {}]   ;;  %s1402_s9 = inlined_call_operand.vmem [shape: f32[1,32], index: 9, kind: input, shape index: {}]   ;;  %s1403_s10 = inlined_call_operand.hbm [shape: f32[2,8,32], index: 10, kind: output, shape index: {}]  }
   0x1   :  { %1418 = sst [smem:[#allocation18_spill]] %s1393_s0 }
   0x2   :  { %1419 = sst [smem:[#allocation19_spill]] %s1394_s1 }
   0x3   :  { %1420 = sst [smem:[#allocation20_spill]] %s1395_s2 }
   0x4   :  { %1421 = sst [smem:[#allocation21_spill]] %s1403_s10 }
   0x5   :  { %15 = vsyncpa [#allocation4], 0 }
   0x6   :  { %17 = vsyncpa [#allocation4 + $0x1], 0  ;;  %s1204_s13 = smov 0   ;;  %s1206_s14 = smov 0  }
   0x7   :  { %s1208_s15 = smov 0   ;;  %s1210_s16 = smov 0  }
   0x8   :  { %s1212_s17 = smov 0   ;;  %s1214_s18 = smov 0  }
   0x9   :  { %s1216_s19 = smov 0   ;;  %s1218_s20 = smov 0  }
   0xa LB: > { %1422 = sst [smem:[#allocation6_spill]] %s1118_s13  ;;  %s912_s21 = sadd.s32 4294967295, %s1146_s20   ;;  %s1146_s20 = sphi %s1218_s20, %s23_s20   ;;  %s1142_s19 = sphi %s1216_s19, %s1454_s19   ;;  %s1138_s18 = sphi %s1214_s18, %s1453_s18   ;;  %s1134_s17 = sphi %s1212_s17, %s1452_s17   ;;  %s1130_s16 = sphi %s1210_s16, %s1451_s16   ;;  %s1126_s15 = sphi %s1208_s15, %s1450_s15   ;;  %s1122_s14 = sphi %s1206_s14, %s1449_s14   ;;  %s1118_s13 = sphi %s1204_s13, %s1448_s13  }
   0xb   : > { %1423 = sst [smem:[#allocation7_spill]] %s1122_s14  ;;  %s913_s22 = sadd.s32 4294967294, %s1146_s20  }
   0xc   : > { %1424 = sst [smem:[#allocation8_spill]] %s1126_s15  ;;  %s35_s23 = sadd.s32 1, %s1138_s18 }
   0xd   : > { %1425 = sst [smem:[#allocation9_spill]] %s1134_s17  ;;  %p36_p0 = scmp.ge.s32.totalorder %s35_s23, 4 }
   0xe   : > { %1426 = sst [smem:[#allocation10_spill]] %s1138_s18  ;;  %s42_s24 = sadd.s32 1, %s1142_s19 }
   0xf   : > { %1427 = sst [smem:[#allocation11_spill]] %s1142_s19  ;;  %p318_p1 = scmp.ne.s32.totalorder %s1126_s15, %s1122_s14 }
  0x10   : > { %1428 = sst [smem:[#allocation12_spill]] %s1146_s20  ;;  %p319_p2 = scmp.eq.s32.totalorder %s912_s21, 7 }
  0x11   : > { %s1456_s23 = smov (%p36_p0, %s35_s23), 0  ;;  %s1458_s24 = smov (!%p36_p0, %s42_s24), %s1142_s19 }
  0x12   : > { %1429 = sst [smem:[#allocation13_spill]] %s1456_s23  ;;  %p1253_p3 = por %p319_p2, %p318_p1 }
  0x13   : > { %p324_p4 = scmp.ne.s32.totalorder %s1122_s14, %s1118_s13  ;;  %p44_p5 = scmp.ge.s32.totalorder %s1458_s24, 2 }
  0x14   : > { %s1430_s25 = scalar_select %p1253_p3, 1, 0 }
  0x15   : > { %p325_p6 = scmp.eq.s32.totalorder %s913_s22, 7  ;;  %p916_p7 = scmp.ge.s32.totalorder %s1146_s20, 1 }
  0x16   : > { %1431 = sst [smem:[#allocation14_spill]] %s1430_s25  ;;  %p412_p8 = scmp.lt.s32.totalorder %s1146_s20, 9 }
  0x17   : > { %s1460_s24 = smov (%p44_p5, %s1458_s24), 0  ;;  %p1263_p9 = por %p325_p6, %p324_p4 }
  0x18   : > { %1432 = sst [smem:[#allocation15_spill]] %s1460_s24  ;;  %p413_p10 = pnand %p916_p7, %p412_p8 }
  0x19   : > { %s1433_s26 = scalar_select %p1263_p9, 1, 0 }
  0x1a   : > { %s303_s27 = ssub.s32 %s1142_s19, %s1460_s24  ;;  %s308_s28 = sadd.s32 1, %s1126_s15 }
  0x1b   : > { %1434 = sst [smem:[#allocation16_spill]] %s1433_s26  ;;  %p306_p11 = scmp.eq.s32.totalorder %s303_s27, 0 }
  0x1c   : > { %416 = sbr.rel (%p413_p10) target bundleno = 873 (0x369), region = 60  ;;  %s1406_s30 = sand.u32 (!%p413_p10), 1, %s1122_s14  }
  0x1d   : > { %s1271_s29 = scalar_select %p306_p11, %s1126_s15, %s308_s28  }
  0x1e   : > { %p484_p12 = scmp.lt.s32.totalorder (!%p413_p10), %s1134_s17, 1  ;;  %s1277_s11 = sshll.u32 (!%p413_p10), %s1406_s30, 3 }
  0x1f   : > { %1435 = sst [smem:[#allocation17_spill]] %s1271_s29  ;;  %p495_p13 = scmp.lt.s32.totalorder (!%p413_p10), %s1130_s16, 3 }
  0x20   : > { %s1436_s0 = sld [smem:[#allocation18_spill]] (!%p413_p10)  ;;  %s483_s14 = scalar_lea.vmem (!%p413_p10), [#allocation3], %s1277_s11 }
  0x21   : > { %s485_s12 = scalar_select %p484_p12, %s1134_s17, 1 }
  0x22   : > { %s1282_s21 = scalar_select %p495_p13, %s1130_s16, 3 }
  0x23   : > { %s918_s22 = sshll.u32 %s485_s12, 3  ;;  %s1437_s1 = sld [smem:[#allocation19_spill]] }
  0x24   : > { %s963_s18 = sshll.u32 %s1282_s21, 4  ;;  %s502_s26 = scalar_lea.vmem %s1396_s3, %s1282_s21 }
  0x25   : > { %s1438_s2 = sld [smem:[#allocation20_spill]]  ;;  %s507_s12 = scalar_lea.vmem %s1397_s4, %s963_s18 }
  0x26   : > { %s490_s24 = scalar_lea.vmem %s1436_s0, %s918_s22  ;;  %s510_s28 = scalar_lea.vmem %s1398_s5, %s1282_s21 }
  0x27   : > { %s1308_s23 = scalar_lea.vmem %s1399_s6, %s963_s18  ;;  %s518_s29 = scalar_lea.vmem %s1400_s7, %s1282_s21 }
  0x28   : > { %p927_p0 = scmp.ne.s32.totalorder %s1130_s16, 0 }
  0x29   : > { %s494_s30 = scalar_lea.vmem %s1437_s1, %s918_s22  ;;  %s926_s1 = sshll.u32 %s1282_s21, 2 }
  0x2a   : > { %527 = sbr.rel (%p927_p0) target bundleno = 49 (0x31), region = 64 }
  0x2b   : > { %s499_s10 = scalar_lea.vmem %s1438_s2, %s963_s18  ;;  %s1318_s2 = scalar_lea.vmem %s1401_s8, %s926_s1 }
  0x2f   : > { %vm528_vm0 = vcmask 261120   ;;  %v1148_v0 = vmov 0.0  }
  0x30   : > { %529 = vst.msk [vmem:[#allocation2] sm:$0xff] %vm528_vm0, %v1148_v0 }
  0x31 PF: > { %v967_v1 = vld [vmem:[%s499_s10 + $0x8] sm:$0xff]  ;;  %v966_v3 = vld [vmem:[%s499_s10] sm:$0xff]  ;;  %vm563_vm1 = vcmask 261120   ;;  %vm644_vm2 = vcmask 64512   ;;  %vm680_vm3 = vcmask 1043456   ;;  %p958_p1 = scmp.ne.s32.totalorder %s1130_s16, 3 }
  0x32   : > { %v969_v2 = vld [vmem:[%s507_s12 + $0x8] sm:$0xff]  ;;  %v968_v4 = vld [vmem:[%s507_s12] sm:$0xff]  ;;  %573 = vmatpush.bf16.msra.mxu0 %v967_v1 }
  0x33   : > { %v530_v5 = vld [vmem:[%s490_s24] sm:$0xff]  ;;  %605 = vmatpush.bf16.msra.mxu1 %v969_v2  ;;  %v971_v21 = vld [vmem:[%s1308_s23 + $0x8] sm:$0xff] }
  0x34   : > { %v532_v6 = vld [vmem:[%s494_s30] sm:$0xff]  ;;  %v531_v7 = vpack.c.bf16 %v530_v5, %v530_v5  ;;  %634 = vmatpush.bf16.msra.mxu2 %v971_v21 }
  0x35   : > { %v533_v8 = vpack.c.bf16 %v532_v6, %v532_v6  ;;  %v1044_v9 = vld [vmem:[%s502_s26] ss:$0 sm:$0xff] }
  0x36   : > { %574 = vmatpush.bf16.msra.mxu0 %v966_v3  ;;  %v1045_v10 = vld [vmem:[%s510_s28] ss:$0 sm:$0xff] }
  0x37   : > { %606 = vmatpush.bf16.msra.mxu1 %v968_v4  ;;  %v970_v22 = vld [vmem:[%s1308_s23] sm:$0xff] }
  0x38   : > { %635 = vmatpush.bf16.msra.mxu2 %v970_v22  ;;  %v1046_v26 = vld [vmem:[%s518_s29] ss:$0 sm:$0xff] }
  0x39   : > { %936 = vmatmul.msk.bf16.vlgmr.msra.gmra.mxu0 %vm563_vm1, %v531_v7  ;;  %v546_v37 = vld [vmem:[%s1318_s2] sm:$0xf] }
  0x3a   : > { %945 = vmatmul.msk.bf16.vlgmr.msra.gmra.mxu1 %vm563_vm1, %v533_v8  ;;  %v703_v38 = vsel %vm680_vm3, %v546_v37, 0  ;;  %v697_v46 = vld [vmem:[#allocation2] sm:$0xff] }
  0x3b   : > { %954 = vmatmul.msk.bf16.vlgmr.msra.gmra.mxu2 %vm563_vm1, %v533_v8  ;;  %712 = vmatpush.bf16.msrb.mxu1 %v703_v38 }
  0xb6   : > { %v576_v11 = vpop.f32.mrf.mxu0 }
  0xb7   : > { %v608_v12 = vpop.f32.mrf.mxu1  ;;  %v577_v13 = vadd.f32 %v1044_v9, %v576_v11 }
  0xb8   : > { %v609_v14 = vadd.f32 %v1045_v10, %v608_v12 }
  0xb9   : > { %v641_v16 = vmul.f32 0.35355338, %v577_v13 }
  0xba   : > { %v643_v15 = vpack.c.bf16 %v609_v14, %v609_v14 }
  0xbb   : > { %v642_v20 = vpack.c.bf16 %v641_v16, %v641_v16 }
  0xbc   : > { %v649_v17 = vsel %vm644_vm2, %v643_v15, 0 }
  0xbd   : > { %658 = vmatpush.bf16.xpose.msra.mxu3 %v649_v17 }
  0xbe   : > { %v578_v18 = vpop.f32.mrf.mxu0  ;;  %v637_v27 = vpop.f32.mrf.mxu2 }
  0xbf   : > { %v610_v19 = vpop.f32.mrf.mxu1  ;;  %v638_v29 = vadd.f32 %v1046_v26, %v637_v27 }
  0xc1   : > { %v676_v31 = vpack.c.bf16 %v638_v29, %v638_v29 }
  0xc3   : > { %v682_v33 = vsel %vm680_vm3, %v676_v31, 0 }
  0xc4   : > { %955 = vmatmul.msk.bf16.vlgmr.msra.gmra.mxu3 %vm644_vm2, %v642_v20  ;;  %691 = vmatpush.bf16.msrb.mxu0 %v682_v33 }
  0xc6   : > { %v639_v34 = vpop.f32.mrf.mxu2 }
 0x147   : > { %v660_v23 = vpop.f32.mrf.mxu3 }
 0x148   : > { %v664_v24 = vsel %vm644_vm2, %v660_v23, -inf }
 0x149   : > { %665 = vmax.xlane.f32.xlu0 %v664_v24 }
 0x14f   : > { %v662_v25 = vpop.f32.mrf.mxu3 }
 0x1bc   : > { %v666_v28 = vpop.xlane.xlu0 %665 }
 0x1bd   : > { %v667_v30 = vsub.f32 %v660_v23, %v666_v28 }
 0x1bf   : > { %v668_v32 = vmul.f32 1.442695, %v667_v30 }
 0x1c1   : > { %1047 = vpow2.f32 %v668_v32 }
 0x1c7   : > { %v1048_v35 = vpop.eup %1047 }
 0x1c8   : > { %v670_v36 = vsel %vm644_vm2, %v1048_v35, 0.0 }
 0x1c9   : > { %671 = vadd.xlane.f32.xlu0 %v670_v36 }
 0x23c   : > { %v672_v39 = vpop.xlane.xlu0 %671 }
 0x23d   : > { %1049 = vrcp.f32 %v672_v39 }
 0x243   : > { %v1050_v40 = vpop.eup %1049 }
 0x244   : > { %v674_v41 = vmul.f32 %v1050_v40, %v1048_v35 }
 0x246   : > { %v675_v42 = vpack.c.bf16 %v674_v41, %v674_v41 }
 0x248   : > { %956 = vmatmul.msk.bf16.vlgmr.msrb.gmra.mxu0 %vm644_vm2, %v675_v42 }
 0x2c5   : > { %v693_v43 = vpop.f32.mrf.mxu0 }
 0x2c6   : > { %v698_v44 = vpack.c.bf16 %v693_v43, %v693_v43 }
 0x2c8   : > { %957 = vmatmul.msk.bf16.vlgmr.msrb.gmra.mxu1 %vm644_vm2, %v698_v44 }
 0x2cd   : > { %v695_v45 = vpop.f32.mrf.mxu0 }
 0x345   : > { %v714_v47 = vpop.f32.mrf.mxu1 }
 0x346   : > { %v718_v48 = vadd.f32 %v714_v47, %v697_v46 }
 0x348   : > { %719 = vst.msk [vmem:[#allocation2] sm:$0xff] %vm563_vm1, %v718_v48 }
 0x349   : > { %723 = sbr.rel (%p958_p1) target bundleno = 851 (0x353), region = 68 }
 0x34d   : > { %v716_v49 = vpop.f32.mrf.mxu1 }
 0x34e   : > { %v1051_v51 = vld [vmem:[%s1402_s9] ss:$0 sm:$0xff] }
 0x34f   : > { %v724_v50 = vld [vmem:[#allocation2] sm:$0xff] }
 0x350   : > { %v729_v52 = vadd.f32 %v1051_v51, %v724_v50 }
 0x352   : > { %730 = vst.msk [vmem:[%s483_s14] sm:$0xff] %vm563_vm1, %v729_v52 }
 0x353 PF: > { %s1439_s17 = sld [smem:[#allocation9_spill]]  ;;  %s745_s27 = sshll.u32 %s483_s14, 4  ;;  %s746_s27 = int_to_ptr.vmem [resolvable:$true] %s745_s27 }
 0x354   : > { %s1440_s18 = sld [smem:[#allocation7_spill]] }
 0x355   : > { %s1442_s16 = sld [smem:[#allocation21_spill]] }
 0x359   : > { %s960_s25 = sshll.u32 %s1439_s17, 3 }
 0x35a   : > { %s1444_s19 = sand.u32 1, %s1440_s18  }
 0x35b   : > { %s1443_s21 = smov %s1442_s16  ;;  %s743_s12 = scalar_lea.hbm %s1442_s16, %s960_s25 }
 0x35c   : > { %s747_s28 = sshll.u32 %s743_s12, 4  ;;  %s732_s23 = scalar_lea.sflag [#allocation4], %s1444_s19  ;;  %s748_s28 = int_to_ptr.hbm [resolvable:$true] %s747_s28 }
 0x35d   : > { %s1066_s22 = sshra.s32 %s748_s28, 4  ;;  %s1072_s20 = scalar_lea.hbm %s1443_s21, 16  ;;  %s1067_s22 = int_to_ptr.hbm [resolvable:$true] %s1066_s22 }
 0x35e   : > { %s1068_s15 = scalar_lea.hbm %s1067_s22, 8  ;;  %p1073_p6 = scmp.lt.s32.totalorder %s1067_s22, %s1443_s21 }
 0x35f   : > { %p1069_p2 = scmp.ne.s32.totalorder %s1067_s22, %s1068_s15  ;;  %p1074_p7 = scmp.lt.s32.totalorder %s1072_s20, %s1068_s15 }
 0x361   : > { %p1070_p4 = pnand %p1069_p2, %p1253_p3  ;;  %p1075_p8 = por %p1074_p7, %p1073_p6 }
 0x363   : > { %p1071_p5 = pneg %p1070_p4 }
 0x365   : > { %p1076_p10 = pnand %p1075_p8, %p1071_p5 }
 0x367   : > { %1079 = shalt.err (!%p1076_p10)
}
 0x368   : > { %972 = dma.vmem_to_hbm [thread:$0]  (%p1253_p3), %s746_s27, 128, %s748_s28, %s732_s23  }
 0x369 PF: > { %s1445_s11 = sld [smem:[#allocation12_spill]] }
 0x36a   : > { %s1446_s14 = sld [smem:[#allocation6_spill]] }
 0x36f   : > { %p978_p11 = scmp.ge.s32.totalorder %s1445_s11, 2 }
 0x370   : > { %s759_s10 = sand.u32 1, %s1446_s14  }
 0x371   : > { %p975_p12 = pnand %p978_p11, %p1263_p9  ;;  %s760_s17 = scalar_lea.sflag [#allocation4], %s759_s10 }
 0x373   : > { %p976_p13 = pneg %p975_p12 }
 0x375   : > { %1113 = dma.done.wait (%p976_p13), %s760_s17, 128  }
 0x376   : > { %1115 = vsyncadd (%p976_p13), %s760_s17, 4294967168  ;;  %s23_s20 = sadd.s32 1, %s1445_s11   ;;  %s1448_s13 = sld [smem:[#allocation7_spill]] }
 0x377   : > { %p20_p0 = scmp.ge.s32.totalorder %s23_s20, 10   ;;  %s1449_s14 = sld [smem:[#allocation8_spill]] }
 0x378   : > { %s1450_s15 = sld [smem:[#allocation17_spill]] }
 0x379   : > { %s1451_s16 = sld [smem:[#allocation10_spill]]  ;;  %22 = sbr.rel (!%p20_p0) target bundleno = 10 (0xa), region = 127 }
 0x37a   : > { %s1452_s17 = sld [smem:[#allocation11_spill]] }
 0x37b   : > { %s1453_s18 = sld [smem:[#allocation13_spill]] }
 0x37c   : > { %s1454_s19 = sld [smem:[#allocation15_spill]] }
 0x37e   :  { %766 = vsyncpa [#allocation4], 1 }
 0x37f   :  { %768 = vsyncpa [#allocation4 + $0x1], 1 }

</bundles_post_ra>
